<compile_context>
chip_gen: v6e
topology: v6e:2x2x1
jax: 0.10.0
libtpu: 0.0.40
codegen_flags: <defaults>
</compile_context>

<pallas_src>
import functools

import numpy as np
import jax
import jax.numpy as jnp
from jax.experimental import pallas as pl
from jax.experimental.pallas import tpu as pltpu


N_TEACHER_CROPS = 2  # DINO always uses the 2 global crops for the teacher


def _dino_loss_kernel(inv_temp_ref, student_ref, teacher_ref, center_ref,
                      loss_part_ref, center_part_ref,
                      te_ref, inv_denom_ref, dot_acc_ref, cw_acc_ref, tsum_ref,
                      *, ncrops, inv_student_temp, valid_rows):
    """Grid = (batch tiles ["parallel"], crops ["arbitrary"]).

    Block shapes seen by the kernel:
      inv_temp_ref:    (1, 1)       f32  SMEM   (1 / teacher_temp)
      student_ref:     (1, tB, D)   input dtype (crop v of this batch tile)
      teacher_ref:     (2, tB, D)   input dtype (both global crops; constant
                                    block index over the crop axis -> one DMA
                                    per batch tile)
      center_ref:      (1, D)       f32
      loss_part_ref:   (1, 1, 1)    f32  (per-tile loss sum)
      center_part_ref: (1, 1, D)    f32  (per-tile teacher column sum)
    Scratch (persists across the crop axis):
      te_ref:        (2, tB, D) f32  un-normalized teacher softmax
      inv_denom_ref: (2, tB, 1) f32  exact 1 / sum_d te
      dot_acc_ref:   (2, tB, 1) f32  sum_{v != iq} sum_d te_iq * s_v
      cw_acc_ref:    (tB, 1)    f32  sum_v weight(v) * (max_v + lse_v)
      tsum_ref:      (1, D)     f32  teacher column sum (center EMA stats)
    """
    v = pl.program_id(1)
    tile_b = student_ref.shape[1]

    if valid_rows is not None:
        row0 = pl.program_id(0) * tile_b
        rows = jax.lax.broadcasted_iota(jnp.int32, (tile_b, 1), 0) + row0
        row_mask = (rows < valid_rows).astype(jnp.float32)          # (tB, 1)
    else:
        row_mask = None

    # ---- once per batch tile: teacher softmax stats + center column sum ----
    @pl.when(v == 0)
    def _teacher_pass():
        inv_temp = inv_temp_ref[0, 0]
        center = center_ref[...].astype(jnp.float32)                 # (1, D)
        dot_acc_ref[...] = jnp.zeros_like(dot_acc_ref)
        cw_acc_ref[...] = jnp.zeros_like(cw_acc_ref)
        tsum = jnp.zeros((1, center.shape[-1]), jnp.float32)
        for iq in range(N_TEACHER_CROPS):
            t_raw = teacher_ref[iq].astype(jnp.float32)               # (tB, D)
            # Padded rows are exact zeros (jnp.pad), so no mask needed here.
            tsum = tsum + jnp.sum(t_raw, axis=0, keepdims=True)
            t = (t_raw - center) * inv_temp
            t = t - jnp.max(t, axis=-1, keepdims=True)
            te = jnp.exp(t)                                           # un-normalized q
            te_ref[iq] = te
            denom = jnp.sum(te, axis=-1, keepdims=True)               # (tB, 1)
            inv_denom_ref[iq] = 1.0 / denom        # exact; tiny (tB, 1) column
        tsum_ref[...] = tsum

    # ---- per student crop: per-row lse scalar + te.s row dots ---------------
    s = student_ref[0].astype(jnp.float32) * inv_student_temp         # (tB, D)
    m = jnp.max(s, axis=-1, keepdims=True)
    lse = jnp.log(jnp.sum(jnp.exp(s - m), axis=-1, keepdims=True))
    c_v = m + lse                                                      # (tB, 1)
    # Crop v pairs with every teacher crop iq != v -> weight 2 (local crops)
    # or 1 (global crops 0/1).
    weight = (jnp.float32(N_TEACHER_CROPS)
              - (v < N_TEACHER_CROPS).astype(jnp.float32))
    cw = c_v * weight
    if row_mask is not None:
        cw = cw * row_mask
    cw_acc_ref[...] = cw_acc_ref[...] + cw
    for iq in range(N_TEACHER_CROPS):
        # TODO(synk): if the XLU saturates on v6e, push these axis=-1 reduces
        # through the idle MXU (bf16 ones-matvec) instead of the XLU.
        d = jnp.sum(te_ref[iq] * s, axis=-1, keepdims=True)           # (tB, 1)
        d = d * (v != iq).astype(jnp.float32)
        if row_mask is not None:
            d = d * row_mask
        dot_acc_ref[iq] = dot_acc_ref[iq] + d

    # ---- finalize after the last crop ---------------------------------------
    @pl.when(v == ncrops - 1)
    def _finalize():
        per_row = cw_acc_ref[...]                                      # (tB, 1)
        for iq in range(N_TEACHER_CROPS):
            per_row = per_row - dot_acc_ref[iq] * inv_denom_ref[iq]
        loss_part_ref[...] = jnp.sum(per_row, axis=0,
                                     keepdims=True).reshape(loss_part_ref.shape)
        center_part_ref[...] = tsum_ref[...].reshape(center_part_ref.shape)


def _sublane_granularity(dtype):
    """Sublane row granularity for clean tiling of the batch axis."""
    size = jnp.dtype(dtype).itemsize
    if size >= 4:
        return 8
    if size == 2:
        return 16      # bf16 packs two rows per sublane
    return 32          # int8 / fp8


def _vmem_plan():
    """Generation-aware (planning budget, vmem_limit_bytes)."""
    cap = 64 * 1024 * 1024
    try:
        cap = int(pltpu.get_tpu_info().vmem_capacity_bytes)
    except Exception:
        pass
    if cap >= 96 * 1024 * 1024:
        # v5e / v6e: 128 MiB physical -> allow big tiles (HBM-bound kernel).
        limit = 96 * 1024 * 1024
    else:
        # v7x: 64 MiB physical per TensorCore -> leave headroom.
        limit = 40 * 1024 * 1024
    budget = int(limit * 0.75)   # headroom for compiler scratch / small blocks
    return budget, limit


def _choose_tile_rows(batch_padded, out_dim, itemsize, gran, budget_bytes,
                      tile_rows=None):
    """Largest batch-row tile that fits the VMEM budget (inputs + scratch)."""
    if tile_rows is not None:
        assert tile_rows % gran == 0 and batch_padded % tile_rows == 0
        return tile_rows
    # Per-row VMEM cost (bytes), counting the double-buffered input blocks AND
    # the in-kernel f32 intermediates:
    #   student (1,tB,D)  x2 buffers : 2 * D * itemsize
    #   teacher (2,tB,D)  x2 buffers : 4 * D * itemsize
    #   te scratch (2,tB,D) f32      : 8 * D
    #   f32 working temps (s, exp..) : ~12 * D
    per_row = out_dim * (6 * itemsize + 20)
    tb = budget_bytes // max(per_row, 1)
    if batch_padded >= 2 * gran:
        # Keep >= 2 batch tiles so the "parallel" axis feeds both TCs on v7x.
        tb = min(tb, batch_padded // 2)
    tb = min(tb, batch_padded)
    tb = max((tb // gran) * gran, gran)
    while batch_padded % tb != 0:    # must divide the padded batch evenly
        tb -= gran
    return max(tb, gran)


class DINOLossPallas:
    """JAX/Pallas port of the PyTorch DINOLoss module (forward + center EMA)."""

    def __init__(self, out_dim, ncrops, warmup_teacher_temp, teacher_temp,
                 warmup_teacher_temp_epochs, nepochs,
                 student_temp=0.1, center_momentum=0.9, tile_rows=None,
                 buffer_depth=None):
        assert ncrops >= 2
        self.out_dim = out_dim
        self.ncrops = ncrops
        self.student_temp = student_temp
        self.center_momentum = center_momentum
        self.tile_rows = tile_rows
        self.buffer_depth = buffer_depth   # sweepable: pl.Buffered(k) on student
        self.center = jnp.zeros((1, out_dim), jnp.float32)     # buffer, zeros
        self.teacher_temp_schedule = np.concatenate((
            np.linspace(warmup_teacher_temp, teacher_temp,
                        warmup_teacher_temp_epochs),
            np.ones(nepochs - warmup_teacher_temp_epochs) * teacher_temp,
        ))
        self._fwd_cache = {}

    def _build_forward(self, batch, s_dtype, t_dtype):
        ncrops, out_dim = self.ncrops, self.out_dim
        itemsize = max(jnp.dtype(s_dtype).itemsize, jnp.dtype(t_dtype).itemsize)
        gran = max(_sublane_granularity(s_dtype), _sublane_granularity(t_dtype))
        batch_padded = ((batch + gran - 1) // gran) * gran
        budget, vmem_limit = _vmem_plan()
        tile_b = _choose_tile_rows(batch_padded, out_dim, itemsize, gran,
                                   budget, self.tile_rows)
        num_tiles = batch_padded // tile_b
        padded = batch_padded != batch
        # TODO(synk): for out_dim too large for even tile_b == gran, also tile
        # the feature axis with a two-pass / online softmax; D is whole per row.

        kernel = functools.partial(
            _dino_loss_kernel,
            ncrops=ncrops,
            inv_student_temp=float(1.0 / self.student_temp),
            valid_rows=(batch if padded else None),
        )

        student_kwargs = {}
        if self.buffer_depth is not None:
            # Deeper buffering on the (small) per-crop blocks if DMA latency
            # is exposed once the grid gets long.
            student_kwargs["pipeline_mode"] = pl.Buffered(self.buffer_depth)
        student_spec = pl.BlockSpec((1, tile_b, out_dim),
                                    lambda i, v: (v, i, 0), **student_kwargs)

        call = pl.pallas_call(
            kernel,
            out_shape=(
                jax.ShapeDtypeStruct((num_tiles, 1, 1), jnp.float32),
                jax.ShapeDtypeStruct((num_tiles, 1, out_dim), jnp.float32),
            ),
            grid=(num_tiles, ncrops),
            in_specs=[
                pl.BlockSpec(memory_space=pltpu.MemorySpace.SMEM),   # 1/temp
                student_spec,
                pl.BlockSpec((N_TEACHER_CROPS, tile_b, out_dim),
                             lambda i, v: (0, i, 0)),                # teacher
                pl.BlockSpec((1, out_dim), lambda i, v: (0, 0)),     # center
            ],
            out_specs=(
                # TODO(synk): low-value cleanup - pack the per-tile scalar loss
                # into the lane-dense center_part slab to avoid a masked store.
                pl.BlockSpec((1, 1, 1), lambda i, v: (i, 0, 0)),
                pl.BlockSpec((1, 1, out_dim), lambda i, v: (i, 0, 0)),
            ),
            scratch_shapes=[
                pltpu.VMEM((N_TEACHER_CROPS, tile_b, out_dim), jnp.float32),
                pltpu.VMEM((N_TEACHER_CROPS, tile_b, 1), jnp.float32),
                pltpu.VMEM((N_TEACHER_CROPS, tile_b, 1), jnp.float32),
                pltpu.VMEM((tile_b, 1), jnp.float32),
                pltpu.VMEM((1, out_dim), jnp.float32),
            ],
            compiler_params=pltpu.CompilerParams(
                dimension_semantics=("parallel", "arbitrary"),
                vmem_limit_bytes=vmem_limit,
            ),
        )

        n_terms = N_TEACHER_CROPS * (ncrops - 1)
        momentum = float(self.center_momentum)
        n_teacher_rows = float(N_TEACHER_CROPS * batch)
        pad_rows = batch_padded - batch

        def forward(student, teacher, center, inv_temp):
            s3 = student.reshape(ncrops, batch, out_dim)
            t3 = teacher.reshape(N_TEACHER_CROPS, batch, out_dim)
            if pad_rows:
                s3 = jnp.pad(s3, ((0, 0), (0, pad_rows), (0, 0)))
                t3 = jnp.pad(t3, ((0, 0), (0, pad_rows), (0, 0)))
            loss_parts, center_parts = call(inv_temp, s3, t3, center)
            loss = jnp.sum(loss_parts) / (batch * n_terms)
            batch_center = jnp.sum(center_parts, axis=0) / n_teacher_rows
            new_center = center * momentum + batch_center * (1.0 - momentum)
            return loss, new_center

        return jax.jit(forward)

    def __call__(self, student_output, teacher_output, epoch):
        batch = teacher_output.shape[0] // N_TEACHER_CROPS
        assert teacher_output.shape == (N_TEACHER_CROPS * batch, self.out_dim)
        assert student_output.shape == (self.ncrops * batch, self.out_dim)

        key = (batch, str(student_output.dtype), str(teacher_output.dtype))
        fwd = self._fwd_cache.get(key)
        if fwd is None:
            fwd = self._build_forward(batch, student_output.dtype,
                                      teacher_output.dtype)
            self._fwd_cache[key] = fwd

        inv_temp = jnp.full(
            (1, 1), 1.0 / float(self.teacher_temp_schedule[epoch]), jnp.float32)
        loss, new_center = fwd(student_output, teacher_output, self.center,
                               inv_temp)
        self.center = new_center        # buffer update, as in the torch module
        return loss


def _reference_dino_loss(student_output, teacher_output, epoch, center,
                         schedule, ncrops, student_temp, center_momentum):
    """Pure-jnp mirror of the PyTorch forward, for correctness checking."""
    student_out = student_output / student_temp
    B = teacher_output.shape[0] // 2
    student_chunks = [student_out[v * B:(v + 1) * B] for v in range(ncrops)]
    temp = float(schedule[epoch])
    teacher_out = jax.nn.softmax((teacher_output - center) / temp, axis=-1)
    teacher_chunks = [teacher_out[i * B:(i + 1) * B] for i in range(2)]
    total_loss = 0.0
    n_loss_terms = 0
    for iq, q in enumerate(teacher_chunks):
        for v in range(len(student_chunks)):
            if v == iq:
                continue
            loss = jnp.sum(-q * jax.nn.log_softmax(student_chunks[v], axis=-1),
                           axis=-1)
            total_loss += jnp.mean(loss)
            n_loss_terms += 1
    total_loss = total_loss / n_loss_terms
    batch_center = (jnp.sum(teacher_output, axis=0, keepdims=True)
                    / teacher_output.shape[0])
    new_center = center * center_momentum + batch_center * (1 - center_momentum)
    return total_loss, new_center


if __name__ == "__main__":
    def run_case(out_dim, batch, ncrops, epochs, tile_rows=None,
                 dtype=jnp.float32, seed=0):
        key = jax.random.PRNGKey(seed)
        dino = DINOLossPallas(out_dim=out_dim, ncrops=ncrops,
                              warmup_teacher_temp=0.04, teacher_temp=0.07,
                              warmup_teacher_temp_epochs=3, nepochs=10,
                              student_temp=0.1, center_momentum=0.9,
                              tile_rows=tile_rows)
        ref_center = jnp.zeros((1, out_dim), jnp.float32)
        for step, epoch in enumerate(epochs):
            key, k1, k2 = jax.random.split(key, 3)
            student = jax.random.normal(k1, (ncrops * batch, out_dim),
                                        jnp.float32).astype(dtype)
            teacher = jax.random.normal(k2, (2 * batch, out_dim),
                                        jnp.float32).astype(dtype)
            loss = dino(student, teacher, epoch)
            jax.block_until_ready(loss)
            jax.block_until_ready(dino.center)
            ref_loss, ref_center = _reference_dino_loss(
                student.astype(jnp.float32), teacher.astype(jnp.float32),
                epoch, ref_center, dino.teacher_temp_schedule, ncrops, 0.1, 0.9)
            tol = 1e-3 * (1.0 + abs(float(ref_loss)))
            assert abs(float(loss) - float(ref_loss)) < tol, (
                step, float(loss), float(ref_loss))
            assert np.allclose(np.asarray(dino.center), np.asarray(ref_center),
                               atol=1e-5), step

    # Padded single-batch-tile case (batch=2 -> padded to 8 rows, masked),
    # called twice to exercise the shape cache / runtime epoch temperature.
    run_case(out_dim=32, batch=2, ncrops=4, epochs=[1, 2])
    # Multi-tile case: (2, ncrops) grid, "parallel" batch axis + "arbitrary" crops.
    run_case(out_dim=32, batch=16, ncrops=4, epochs=[0], tile_rows=8)
    # bf16 transport (16-row sublane granularity + padding path).
    run_case(out_dim=32, batch=8, ncrops=3, epochs=[0], dtype=jnp.bfloat16)
    print("KERNEL_OK")
</pallas_src>

<mosaic_0001>
module attributes {stable_mosaic.version = 11 : i64} {
  func.func @_dino_loss_kernel(%arg0: i32, %arg1: i32, %arg2: memref<1x1xf32, #tpu.memory_space<smem>>, %arg3: memref<1x8x32xf32, #tpu.memory_space<vmem>>, %arg4: memref<2x8x32xf32, #tpu.memory_space<vmem>>, %arg5: memref<1x32xf32, #tpu.memory_space<vmem>>, %arg6: memref<1x1x1xf32, #tpu.memory_space<vmem>>, %arg7: memref<1x1x32xf32, #tpu.memory_space<vmem>>, %arg8: memref<2x8x32xf32, #tpu.memory_space<vmem>>, %arg9: memref<2x8x1xf32, #tpu.memory_space<vmem>>, %arg10: memref<2x8x1xf32, #tpu.memory_space<vmem>>, %arg11: memref<8x1xf32, #tpu.memory_space<vmem>>, %arg12: memref<1x32xf32, #tpu.memory_space<vmem>>) attributes {dimension_semantics = [#tpu.dimension_semantics<parallel>, #tpu.dimension_semantics<arbitrary>], iteration_bounds = array<i64: 1, 4>, scalar_prefetch = 0 : i64, scratch_operands = 5 : i64, tpu.core_type = #tpu.core_type<tc>, window_params = [{transform_indices = @transform_0, window_bounds = array<i64: 1, 1>}, {transform_indices = @transform_1, window_bounds = array<i64: 1, 8, 32>}, {transform_indices = @transform_2, window_bounds = array<i64: 2, 8, 32>}, {pipeline_mode = #tpu.pipeline_mode<synchronous>, transform_indices = @transform_3, window_bounds = array<i64: 1, 32>}, {transform_indices = @transform_4, window_bounds = array<i64: 1, 1, 1>}, {transform_indices = @transform_5, window_bounds = array<i64: 1, 1, 32>}]} {
    %c8_i32 = arith.constant 8 : i32
    %0 = arith.muli %arg0, %c8_i32 : i32
    %1 = tpu.iota {dimensions = array<i32: 0>} : vector<8x1xi32>
    %2 = vector.broadcast %0 : i32 to vector<8x1xi32>
    %3 = arith.addi %1, %2 : vector<8x1xi32>
    %c2_i32 = arith.constant 2 : i32
    %4 = vector.broadcast %c2_i32 : i32 to vector<8x1xi32>
    %5 = arith.cmpi slt, %3, %4 : vector<8x1xi32>
    %6 = arith.extui %5 : vector<8x1xi1> to vector<8x1xi32>
    %7 = arith.sitofp %6 : vector<8x1xi32> to vector<8x1xf32>
    %c0_i32 = arith.constant 0 : i32
    %8 = arith.cmpi eq, %arg1, %c0_i32 : i32
    %9 = arith.extui %8 : i1 to i32
    %c0_i32_0 = arith.constant 0 : i32
    %10 = arith.cmpi ne, %9, %c0_i32_0 : i32
    scf.if %10 {
      %c0_32 = arith.constant 0 : index
      %c0_33 = arith.constant 0 : index
      %71 = memref.load %arg2[%c0_32, %c0_33] : memref<1x1xf32, #tpu.memory_space<smem>>
      %c0_34 = arith.constant 0 : index
      %c0_35 = arith.constant 0 : index
      %72 = vector.load %arg5[%c0_34, %c0_35] : memref<1x32xf32, #tpu.memory_space<vmem>>, vector<1x32xf32>
      %cst_36 = arith.constant 0.000000e+00 : f32
      %73 = vector.broadcast %cst_36 : f32 to vector<2x8x1xf32>
      %c0_37 = arith.constant 0 : index
      %c0_38 = arith.constant 0 : index
      %c0_39 = arith.constant 0 : index
      %74 = vector.load %arg10[%c0_37, %c0_38, %c0_39] : memref<2x8x1xf32, #tpu.memory_space<vmem>>, vector<2x8x1xf32>
      tpu.vector_store %arg10[%c0_37, %c0_38, %c0_39], %73 {strides = array<i32>} : memref<2x8x1xf32, #tpu.memory_space<vmem>>, vector<2x8x1xf32>,
      %cst_40 = arith.constant 0.000000e+00 : f32
      %75 = vector.broadcast %cst_40 : f32 to vector<8x1xf32>
      %c0_41 = arith.constant 0 : index
      %c0_42 = arith.constant 0 : index
      %76 = vector.load %arg11[%c0_41, %c0_42] : memref<8x1xf32, #tpu.memory_space<vmem>>, vector<8x1xf32>
      tpu.vector_store %arg11[%c0_41, %c0_42], %75 {strides = array<i32>} : memref<8x1xf32, #tpu.memory_space<vmem>>, vector<8x1xf32>,
      %cst_43 = arith.constant 0.000000e+00 : f32
      %77 = vector.broadcast %cst_43 : f32 to vector<1x32xf32>
      %c0_44 = arith.constant 0 : index
      %c0_45 = arith.constant 0 : index
      %c0_46 = arith.constant 0 : index
      %78 = vector.load %arg4[%c0_44, %c0_45, %c0_46] : memref<2x8x32xf32, #tpu.memory_space<vmem>>, vector<1x8x32xf32>
      %79 = vector.shape_cast %78 : vector<1x8x32xf32> to vector<8x32xf32>
      %cst_47 = arith.constant dense<0.000000e+00> : vector<32xf32>
      %80 = vector.multi_reduction <add>, %79, %cst_47 [0] : vector<8x32xf32> to vector<32xf32>
      %81 = vector.shape_cast %80 : vector<32xf32> to vector<1x32xf32>
      %82 = arith.addf %77, %81 : vector<1x32xf32>
      %83 = vector.broadcast %72 : vector<1x32xf32> to vector<8x32xf32>
      %84 = arith.subf %79, %83 : vector<8x32xf32>
      %85 = vector.broadcast %71 : f32 to vector<8x32xf32>
      %86 = arith.mulf %84, %85 : vector<8x32xf32>
      %cst_48 = arith.constant dense<0xFF800000> : vector<8xf32>
      %87 = vector.multi_reduction <maximumf>, %86, %cst_48 [1] : vector<8x32xf32> to vector<8xf32>
      %88 = vector.shape_cast %87 : vector<8xf32> to vector<8x1xf32>
      %89 = vector.broadcast %88 : vector<8x1xf32> to vector<8x32xf32>
      %90 = arith.subf %86, %89 : vector<8x32xf32>
      %91 = math.exp %90 : vector<8x32xf32>
      %c0_49 = arith.constant 0 : index
      %c0_50 = arith.constant 0 : index
      %c0_51 = arith.constant 0 : index
      %92 = vector.load %arg8[%c0_49, %c0_50, %c0_51] : memref<2x8x32xf32, #tpu.memory_space<vmem>>, vector<1x8x32xf32>
      %93 = vector.shape_cast %92 : vector<1x8x32xf32> to vector<8x32xf32>
      %94 = vector.shape_cast %91 : vector<8x32xf32> to vector<1x8x32xf32>
      tpu.vector_store %arg8[%c0_49, %c0_50, %c0_51], %94 {strides = array<i32>} : memref<2x8x32xf32, #tpu.memory_space<vmem>>, vector<1x8x32xf32>,
      %cst_52 = arith.constant dense<0.000000e+00> : vector<8xf32>
      %95 = vector.multi_reduction <add>, %91, %cst_52 [1] : vector<8x32xf32> to vector<8xf32>
      %96 = vector.shape_cast %95 : vector<8xf32> to vector<8x1xf32>
      %cst_53 = arith.constant 1.000000e+00 : f32
      %97 = vector.broadcast %cst_53 : f32 to vector<8x1xf32>
      %98 = arith.divf %97, %96 : vector<8x1xf32>
      %c0_54 = arith.constant 0 : index
      %c0_55 = arith.constant 0 : index
      %c0_56 = arith.constant 0 : index
      %99 = vector.load %arg9[%c0_54, %c0_55, %c0_56] : memref<2x8x1xf32, #tpu.memory_space<vmem>>, vector<1x8x1xf32>
      %100 = vector.shape_cast %99 : vector<1x8x1xf32> to vector<8x1xf32>
      %101 = vector.shape_cast %98 : vector<8x1xf32> to vector<1x8x1xf32>
      tpu.vector_store %arg9[%c0_54, %c0_55, %c0_56], %101 {strides = array<i32>} : memref<2x8x1xf32, #tpu.memory_space<vmem>>, vector<1x8x1xf32>,
      %c1_57 = arith.constant 1 : index
      %c0_58 = arith.constant 0 : index
      %c0_59 = arith.constant 0 : index
      %102 = vector.load %arg4[%c1_57, %c0_58, %c0_59] : memref<2x8x32xf32, #tpu.memory_space<vmem>>, vector<1x8x32xf32>
      %103 = vector.shape_cast %102 : vector<1x8x32xf32> to vector<8x32xf32>
      %cst_60 = arith.constant dense<0.000000e+00> : vector<32xf32>
      %104 = vector.multi_reduction <add>, %103, %cst_60 [0] : vector<8x32xf32> to vector<32xf32>
      %105 = vector.shape_cast %104 : vector<32xf32> to vector<1x32xf32>
      %106 = arith.addf %82, %105 : vector<1x32xf32>
      %107 = vector.broadcast %72 : vector<1x32xf32> to vector<8x32xf32>
      %108 = arith.subf %103, %107 : vector<8x32xf32>
      %109 = vector.broadcast %71 : f32 to vector<8x32xf32>
      %110 = arith.mulf %108, %109 : vector<8x32xf32>
      %cst_61 = arith.constant dense<0xFF800000> : vector<8xf32>
      %111 = vector.multi_reduction <maximumf>, %110, %cst_61 [1] : vector<8x32xf32> to vector<8xf32>
      %112 = vector.shape_cast %111 : vector<8xf32> to vector<8x1xf32>
      %113 = vector.broadcast %112 : vector<8x1xf32> to vector<8x32xf32>
      %114 = arith.subf %110, %113 : vector<8x32xf32>
      %115 = math.exp %114 : vector<8x32xf32>
      %c1_62 = arith.constant 1 : index
      %c0_63 = arith.constant 0 : index
      %c0_64 = arith.constant 0 : index
      %116 = vector.load %arg8[%c1_62, %c0_63, %c0_64] : memref<2x8x32xf32, #tpu.memory_space<vmem>>, vector<1x8x32xf32>
      %117 = vector.shape_cast %116 : vector<1x8x32xf32> to vector<8x32xf32>
      %118 = vector.shape_cast %115 : vector<8x32xf32> to vector<1x8x32xf32>
      tpu.vector_store %arg8[%c1_62, %c0_63, %c0_64], %118 {strides = array<i32>} : memref<2x8x32xf32, #tpu.memory_space<vmem>>, vector<1x8x32xf32>,
      %cst_65 = arith.constant dense<0.000000e+00> : vector<8xf32>
      %119 = vector.multi_reduction <add>, %115, %cst_65 [1] : vector<8x32xf32> to vector<8xf32>
      %120 = vector.shape_cast %119 : vector<8xf32> to vector<8x1xf32>
      %cst_66 = arith.constant 1.000000e+00 : f32
      %121 = vector.broadcast %cst_66 : f32 to vector<8x1xf32>
      %122 = arith.divf %121, %120 : vector<8x1xf32>
      %c1_67 = arith.constant 1 : index
      %c0_68 = arith.constant 0 : index
      %c0_69 = arith.constant 0 : index
      %123 = vector.load %arg9[%c1_67, %c0_68, %c0_69] : memref<2x8x1xf32, #tpu.memory_space<vmem>>, vector<1x8x1xf32>
      %124 = vector.shape_cast %123 : vector<1x8x1xf32> to vector<8x1xf32>
      %125 = vector.shape_cast %122 : vector<8x1xf32> to vector<1x8x1xf32>
      tpu.vector_store %arg9[%c1_67, %c0_68, %c0_69], %125 {strides = array<i32>} : memref<2x8x1xf32, #tpu.memory_space<vmem>>, vector<1x8x1xf32>,
      %c0_70 = arith.constant 0 : index
      %c0_71 = arith.constant 0 : index
      %126 = vector.load %arg12[%c0_70, %c0_71] : memref<1x32xf32, #tpu.memory_space<vmem>>, vector<1x32xf32>
      tpu.vector_store %arg12[%c0_70, %c0_71], %106 {strides = array<i32>} : memref<1x32xf32, #tpu.memory_space<vmem>>, vector<1x32xf32>,
    } else {
    }
    %c0 = arith.constant 0 : index
    %c0_1 = arith.constant 0 : index
    %c0_2 = arith.constant 0 : index
    %11 = vector.load %arg3[%c0, %c0_1, %c0_2] : memref<1x8x32xf32, #tpu.memory_space<vmem>>, vector<1x8x32xf32>
    %12 = vector.shape_cast %11 : vector<1x8x32xf32> to vector<8x32xf32>
    %cst = arith.constant 1.000000e+01 : f32
    %13 = vector.broadcast %cst : f32 to vector<8x32xf32>
    %14 = arith.mulf %12, %13 : vector<8x32xf32>
    %cst_3 = arith.constant dense<0xFF800000> : vector<8xf32>
    %15 = vector.multi_reduction <maximumf>, %14, %cst_3 [1] : vector<8x32xf32> to vector<8xf32>
    %16 = vector.shape_cast %15 : vector<8xf32> to vector<8x1xf32>
    %17 = vector.broadcast %16 : vector<8x1xf32> to vector<8x32xf32>
    %18 = arith.subf %14, %17 : vector<8x32xf32>
    %19 = math.exp %18 : vector<8x32xf32>
    %cst_4 = arith.constant dense<0.000000e+00> : vector<8xf32>
    %20 = vector.multi_reduction <add>, %19, %cst_4 [1] : vector<8x32xf32> to vector<8xf32>
    %21 = vector.shape_cast %20 : vector<8xf32> to vector<8x1xf32>
    %22 = math.log %21 : vector<8x1xf32>
    %23 = arith.addf %16, %22 : vector<8x1xf32>
    %c2_i32_5 = arith.constant 2 : i32
    %24 = arith.cmpi slt, %arg1, %c2_i32_5 : i32
    %25 = arith.extui %24 : i1 to i32
    %26 = arith.sitofp %25 : i32 to f32
    %cst_6 = arith.constant 2.000000e+00 : f32
    %27 = arith.subf %cst_6, %26 : f32
    %28 = vector.broadcast %27 : f32 to vector<8x1xf32>
    %29 = arith.mulf %23, %28 : vector<8x1xf32>
    %30 = arith.mulf %29, %7 : vector<8x1xf32>
    %c0_7 = arith.constant 0 : index
    %c0_8 = arith.constant 0 : index
    %31 = vector.load %arg11[%c0_7, %c0_8] : memref<8x1xf32, #tpu.memory_space<vmem>>, vector<8x1xf32>
    %32 = arith.addf %31, %30 : vector<8x1xf32>
    %c0_9 = arith.constant 0 : index
    %c0_10 = arith.constant 0 : index
    %33 = vector.load %arg11[%c0_9, %c0_10] : memref<8x1xf32, #tpu.memory_space<vmem>>, vector<8x1xf32>
    tpu.vector_store %arg11[%c0_9, %c0_10], %32 {strides = array<i32>} : memref<8x1xf32, #tpu.memory_space<vmem>>, vector<8x1xf32>,
    %c0_11 = arith.constant 0 : index
    %c0_12 = arith.constant 0 : index
    %c0_13 = arith.constant 0 : index
    %34 = vector.load %arg8[%c0_11, %c0_12, %c0_13] : memref<2x8x32xf32, #tpu.memory_space<vmem>>, vector<1x8x32xf32>
    %35 = vector.shape_cast %34 : vector<1x8x32xf32> to vector<8x32xf32>
    %36 = arith.mulf %35, %14 : vector<8x32xf32>
    %cst_14 = arith.constant dense<0.000000e+00> : vector<8xf32>
    %37 = vector.multi_reduction <add>, %36, %cst_14 [1] : vector<8x32xf32> to vector<8xf32>
    %38 = vector.shape_cast %37 : vector<8xf32> to vector<8x1xf32>
    %c0_i32_15 = arith.constant 0 : i32
    %39 = arith.cmpi ne, %arg1, %c0_i32_15 : i32
    %40 = arith.extui %39 : i1 to i32
    %41 = arith.sitofp %40 : i32 to f32
    %42 = vector.broadcast %41 : f32 to vector<8x1xf32>
    %43 = arith.mulf %38, %42 : vector<8x1xf32>
    %44 = arith.mulf %43, %7 : vector<8x1xf32>
    %c0_16 = arith.constant 0 : index
    %c0_17 = arith.constant 0 : index
    %c0_18 = arith.constant 0 : index
    %45 = vector.load %arg10[%c0_16, %c0_17, %c0_18] : memref<2x8x1xf32, #tpu.memory_space<vmem>>, vector<1x8x1xf32>
    %46 = vector.shape_cast %45 : vector<1x8x1xf32> to vector<8x1xf32>
    %47 = arith.addf %46, %44 : vector<8x1xf32>
    %c0_19 = arith.constant 0 : index
    %c0_20 = arith.constant 0 : index
    %c0_21 = arith.constant 0 : index
    %48 = vector.load %arg10[%c0_19, %c0_20, %c0_21] : memref<2x8x1xf32, #tpu.memory_space<vmem>>, vector<1x8x1xf32>
    %49 = vector.shape_cast %48 : vector<1x8x1xf32> to vector<8x1xf32>
    %50 = vector.shape_cast %47 : vector<8x1xf32> to vector<1x8x1xf32>
    tpu.vector_store %arg10[%c0_19, %c0_20, %c0_21], %50 {strides = array<i32>} : memref<2x8x1xf32, #tpu.memory_space<vmem>>, vector<1x8x1xf32>,
    %c1 = arith.constant 1 : index
    %c0_22 = arith.constant 0 : index
    %c0_23 = arith.constant 0 : index
    %51 = vector.load %arg8[%c1, %c0_22, %c0_23] : memref<2x8x32xf32, #tpu.memory_space<vmem>>, vector<1x8x32xf32>
    %52 = vector.shape_cast %51 : vector<1x8x32xf32> to vector<8x32xf32>
    %53 = arith.mulf %52, %14 : vector<8x32xf32>
    %cst_24 = arith.constant dense<0.000000e+00> : vector<8xf32>
    %54 = vector.multi_reduction <add>, %53, %cst_24 [1] : vector<8x32xf32> to vector<8xf32>
    %55 = vector.shape_cast %54 : vector<8xf32> to vector<8x1xf32>
    %c1_i32 = arith.constant 1 : i32
    %56 = arith.cmpi ne, %arg1, %c1_i32 : i32
    %57 = arith.extui %56 : i1 to i32
    %58 = arith.sitofp %57 : i32 to f32
    %59 = vector.broadcast %58 : f32 to vector<8x1xf32>
    %60 = arith.mulf %55, %59 : vector<8x1xf32>
    %61 = arith.mulf %60, %7 : vector<8x1xf32>
    %c1_25 = arith.constant 1 : index
    %c0_26 = arith.constant 0 : index
    %c0_27 = arith.constant 0 : index
    %62 = vector.load %arg10[%c1_25, %c0_26, %c0_27] : memref<2x8x1xf32, #tpu.memory_space<vmem>>, vector<1x8x1xf32>
    %63 = vector.shape_cast %62 : vector<1x8x1xf32> to vector<8x1xf32>
    %64 = arith.addf %63, %61 : vector<8x1xf32>
    %c1_28 = arith.constant 1 : index
    %c0_29 = arith.constant 0 : index
    %c0_30 = arith.constant 0 : index
    %65 = vector.load %arg10[%c1_28, %c0_29, %c0_30] : memref<2x8x1xf32, #tpu.memory_space<vmem>>, vector<1x8x1xf32>
    %66 = vector.shape_cast %65 : vector<1x8x1xf32> to vector<8x1xf32>
    %67 = vector.shape_cast %64 : vector<8x1xf32> to vector<1x8x1xf32>
    tpu.vector_store %arg10[%c1_28, %c0_29, %c0_30], %67 {strides = array<i32>} : memref<2x8x1xf32, #tpu.memory_space<vmem>>, vector<1x8x1xf32>,
    %c3_i32 = arith.constant 3 : i32
    %68 = arith.cmpi eq, %arg1, %c3_i32 : i32
    %69 = arith.extui %68 : i1 to i32
    %c0_i32_31 = arith.constant 0 : i32
    %70 = arith.cmpi ne, %69, %c0_i32_31 : i32
    scf.if %70 {
      %c0_32 = arith.constant 0 : index
      %c0_33 = arith.constant 0 : index
      %71 = vector.load %arg11[%c0_32, %c0_33] : memref<8x1xf32, #tpu.memory_space<vmem>>, vector<8x1xf32>
      %c0_34 = arith.constant 0 : index
      %c0_35 = arith.constant 0 : index
      %c0_36 = arith.constant 0 : index
      %72 = vector.load %arg10[%c0_34, %c0_35, %c0_36] : memref<2x8x1xf32, #tpu.memory_space<vmem>>, vector<1x8x1xf32>
      %73 = vector.shape_cast %72 : vector<1x8x1xf32> to vector<8x1xf32>
      %c0_37 = arith.constant 0 : index
      %c0_38 = arith.constant 0 : index
      %c0_39 = arith.constant 0 : index
      %74 = vector.load %arg9[%c0_37, %c0_38, %c0_39] : memref<2x8x1xf32, #tpu.memory_space<vmem>>, vector<1x8x1xf32>
      %75 = vector.shape_cast %74 : vector<1x8x1xf32> to vector<8x1xf32>
      %76 = arith.mulf %73, %75 : vector<8x1xf32>
      %77 = arith.subf %71, %76 : vector<8x1xf32>
      %c1_40 = arith.constant 1 : index
      %c0_41 = arith.constant 0 : index
      %c0_42 = arith.constant 0 : index
      %78 = vector.load %arg10[%c1_40, %c0_41, %c0_42] : memref<2x8x1xf32, #tpu.memory_space<vmem>>, vector<1x8x1xf32>
      %79 = vector.shape_cast %78 : vector<1x8x1xf32> to vector<8x1xf32>
      %c1_43 = arith.constant 1 : index
      %c0_44 = arith.constant 0 : index
      %c0_45 = arith.constant 0 : index
      %80 = vector.load %arg9[%c1_43, %c0_44, %c0_45] : memref<2x8x1xf32, #tpu.memory_space<vmem>>, vector<1x8x1xf32>
      %81 = vector.shape_cast %80 : vector<1x8x1xf32> to vector<8x1xf32>
      %82 = arith.mulf %79, %81 : vector<8x1xf32>
      %83 = arith.subf %77, %82 : vector<8x1xf32>
      %cst_46 = arith.constant dense<0.000000e+00> : vector<1xf32>
      %84 = vector.multi_reduction <add>, %83, %cst_46 [0] : vector<8x1xf32> to vector<1xf32>
      %85 = vector.shape_cast %84 : vector<1xf32> to vector<1x1xf32>
      %86 = vector.shape_cast %85 : vector<1x1xf32> to vector<1x1x1xf32>
      %c0_47 = arith.constant 0 : index
      %c0_48 = arith.constant 0 : index
      %c0_49 = arith.constant 0 : index
      %87 = vector.load %arg6[%c0_47, %c0_48, %c0_49] : memref<1x1x1xf32, #tpu.memory_space<vmem>>, vector<1x1x1xf32>
      tpu.vector_store %arg6[%c0_47, %c0_48, %c0_49], %86 {strides = array<i32>} : memref<1x1x1xf32, #tpu.memory_space<vmem>>, vector<1x1x1xf32>,
      %c0_50 = arith.constant 0 : index
      %c0_51 = arith.constant 0 : index
      %88 = vector.load %arg12[%c0_50, %c0_51] : memref<1x32xf32, #tpu.memory_space<vmem>>, vector<1x32xf32>
      %89 = vector.shape_cast %88 : vector<1x32xf32> to vector<1x1x32xf32>
      %c0_52 = arith.constant 0 : index
      %c0_53 = arith.constant 0 : index
      %c0_54 = arith.constant 0 : index
      %90 = vector.load %arg7[%c0_52, %c0_53, %c0_54] : memref<1x1x32xf32, #tpu.memory_space<vmem>>, vector<1x1x32xf32>
      tpu.vector_store %arg7[%c0_52, %c0_53, %c0_54], %89 {strides = array<i32>} : memref<1x1x32xf32, #tpu.memory_space<vmem>>, vector<1x1x32xf32>,
    } else {
    }
    return
  }
  func.func @transform_0(%arg0: i32, %arg1: i32) -> (i32, i32) {
    %c0_i32 = arith.constant 0 : i32
    %c0_i32_0 = arith.constant 0 : i32
    %c0_i32_1 = arith.constant 0 : i32
    return %c0_i32, %c0_i32_0 : i32, i32
  }
  func.func @transform_1(%arg0: i32, %arg1: i32) -> (i32, i32, i32) {
    %c0_i32 = arith.constant 0 : i32
    %c0_i32_0 = arith.constant 0 : i32
    return %arg1, %arg0, %c0_i32 : i32, i32, i32
  }
  func.func @transform_2(%arg0: i32, %arg1: i32) -> (i32, i32, i32) {
    %c0_i32 = arith.constant 0 : i32
    %c0_i32_0 = arith.constant 0 : i32
    %c0_i32_1 = arith.constant 0 : i32
    return %c0_i32, %arg0, %c0_i32_0 : i32, i32, i32
  }
  func.func @transform_3(%arg0: i32, %arg1: i32) -> (i32, i32) {
    %c0_i32 = arith.constant 0 : i32
    %c0_i32_0 = arith.constant 0 : i32
    %c0_i32_1 = arith.constant 0 : i32
    return %c0_i32, %c0_i32_0 : i32, i32
  }
  func.func @transform_4(%arg0: i32, %arg1: i32) -> (i32, i32, i32) {
    %c0_i32 = arith.constant 0 : i32
    %c0_i32_0 = arith.constant 0 : i32
    %c0_i32_1 = arith.constant 0 : i32
    return %arg0, %c0_i32, %c0_i32_0 : i32, i32, i32
  }
  func.func @transform_5(%arg0: i32, %arg1: i32) -> (i32, i32, i32) {
    %c0_i32 = arith.constant 0 : i32
    %c0_i32_0 = arith.constant 0 : i32
    %c0_i32_1 = arith.constant 0 : i32
    return %arg0, %c0_i32, %c0_i32_0 : i32, i32, i32
  }
}

</mosaic_0001>

<bundles_post_ra>
// kernel: forward.1
= control target key start
LH: loop header
LB: loop body
LE: loop exit
PB: predicated region body
PF: predicated region fallthrough
CT: control target
= control target key end

     0   :  { %s773_s0 = inlined_call_operand.<no memory space> [shape: f32[1,1], index: 0, kind: input, shape index: {}]   ;;  %s774_s1 = inlined_call_operand.vmem [shape: f32[4,8,32], index: 1, kind: input, shape index: {}]   ;;  %s775_s2 = inlined_call_operand.vmem [shape: f32[2,8,32], index: 2, kind: input, shape index: {}]   ;;  %s776_s3 = inlined_call_operand.vmem [shape: f32[1,32], index: 3, kind: input, shape index: {}]   ;;  %s777_s4 = inlined_call_operand.hbm [shape: f32[1,1,1], index: 4, kind: output, shape index: {0}]   ;;  %s778_s5 = inlined_call_operand.vmem [shape: f32[1,1,32], index: 5, kind: output, shape index: {1}]  }
   0x1   :  { %11 = sst [smem:[#allocation7]] %s773_s0 }
   0x2   :  { %12 = vsyncpa [#allocation9], 0  ;;  %s672_s20 = smov 0   ;;  %s674_s21 = smov 0  }
   0x3   :  { %s676_s22 = smov 0  }
   0x4 LB: > { %s523_s0 = sadd.s32 4294967295, %s634_s22   ;;  %s27_s23 = sadd.s32 1, %s630_s21  ;;  %s634_s22 = sphi %s676_s22, %s18_s22   ;;  %s630_s21 = sphi %s674_s21, %s781_s21   ;;  %s626_s20 = sphi %s672_s20, %s780_s20  }
   0x5   : > { %p28_p0 = scmp.ge.s32.totalorder %s27_s23, 4  ;;  %p527_p1 = scmp.ge.s32.totalorder %s634_s22, 1 }
   0x6   : > { %p217_p2 = scmp.lt.s32.totalorder %s634_s22, 5 }
   0x7   : > { %s783_s23 = smov (%p28_p0, %s27_s23), 0 }
   0x8   : > { %p218_p3 = pnand %p527_p1, %p217_p2 }
   0x9   : > { %p249_p4 = scmp.lt.s32.totalorder (!%p218_p3), %s626_s20, 3  ;;  %p530_p5 = scmp.ne.s32.totalorder (!%p218_p3), %s626_s20, 0 }
   0xa   : > { %221 = sbr.rel (%p218_p3) target bundleno = 706 (0x2c2), region = 36 }
   0xf   : > { %v264_v0 = vlaneseq  ;;  %s250_s24 = scalar_select %p249_p4, %s626_s20, 3  ;;  %v636_v2 = vmov 0.0  }
  0x10   : > { %274 = sbr.rel (%p530_p5) target bundleno = 342 (0x156), region = 40  ;;  %s275_s29 = sld [smem:[#allocation7]] (!%p530_p5) }
  0x11   : > { %v265_v1 = vshrl.u32 %v264_v0, 7  ;;  %s528_s25 = sshll.u32 %s250_s24, 3 }
  0x12   : > { %s698_s28 = scalar_lea.vmem %s774_s1, %s528_s25 }
  0x13   : > { %vm268_vm0 = vcmp.lt.s32.totalorder %v265_v1, 2 }
  0x14   : > { %v700_v3 = vsel %vm268_vm0, 1.0, %v636_v2 }
  0x15   : > { %v531_v4 = vld [vmem:[%s776_s3] ss:$0 sm:$0xff]  ;;  %vm282_vm1 = vcmask 261120   ;;  %v532_v7 = vld [vmem:[%s775_s2 + $0x8] sm:$0xff]  ;;  %vm340_vm2 = vcmask 253952   ;;  %vm277_vm3 = vcmask 7168  }
  0x16   : > { %v281_v5 = vld [vmem:[%s775_s2] sm:$0xff]  ;;  %v315_v9 = vsel %vm282_vm1, %v532_v7, 0.0  ;;  %v323_v12 = vsub.f32 %v532_v7, %v531_v4  ;;  %v298_v16 = vstv %s275_s29  ;;  %v637_v29 = vmov 0.0  }
  0x17   : > { %v283_v6 = vsel %vm282_vm1, %v281_v5, 0.0  ;;  %v297_v10 = vsub.f32 %v281_v5, %v531_v4  ;;  %v316_v11 = vrot.slane %v315_v9, 4  ;;  %278 = vst.msk [vmem:[#allocation4] sm:$0xff] %vm277_vm3, %v637_v29  ;;  %279 = vst.msk [vmem:[#allocation4 + $0x8] sm:$0xff] %vm277_vm3, %v637_v29 }
  0x18   : > { %v284_v8 = vrot.slane %v283_v6, 4  ;;  %v324_v19 = vmul.f32 %v323_v12, %v298_v16  ;;  %280 = vst.msk [vmem:[#allocation5] sm:$0xff] %vm277_vm3, %v637_v29 }
  0x19   : > { %v317_v14 = vadd.f32 %v316_v11, %v315_v9  ;;  %v299_v17 = vmul.f32 %v298_v16, %v297_v10 }
  0x1a   : > { %v285_v13 = vadd.f32 %v284_v8, %v283_v6  ;;  %v325_v25 = vsel %vm282_vm1, %v324_v19, -inf }
  0x1b   : > { %v318_v18 = vrot.slane %v317_v14, 2  ;;  %v300_v21 = vsel %vm282_vm1, %v299_v17, -inf }
  0x1c   : > { %v286_v15 = vrot.slane %v285_v13, 2  ;;  %301 = vmax.xlane.f32.xlu0 %v300_v21 }
  0x1d   : > { %v319_v22 = vadd.f32 %v318_v18, %v317_v14 }
  0x1e   : > { %v287_v20 = vadd.f32 %v286_v15, %v285_v13 }
  0x1f   : > { %v320_v24 = vrot.slane %v319_v22, 1 }
  0x20   : > { %v288_v23 = vrot.slane %v287_v20, 1  ;;  %326 = vmax.xlane.f32.xlu0 %v325_v25 }
  0x21   : > { %v321_v27 = vadd.f32 %v320_v24, %v319_v22 }
  0x22   : > { %v289_v26 = vadd.f32 %v288_v23, %v287_v20 }
  0x24   : > { %v322_v28 = vadd.f32 %v321_v27, %v289_v26 }
  0x26   : > { %341 = vst.msk [vmem:[#allocation6] sm:$0x1] %vm340_vm2, %v322_v28 }
  0xa5   : > { %v302_v30 = vpop.xlane.xlu0 %301 }
  0xa6   : > { %v303_v31 = vsub.f32 %v299_v17, %v302_v30 }
  0xa8   : > { %v304_v32 = vmul.f32 1.442695, %v303_v31 }
  0xa9   : > { %v327_v33 = vpop.xlane.xlu0 %326 }
  0xaa   : > { %572 = vpow2.f32 %v304_v32  ;;  %v328_v34 = vsub.f32 %v324_v19, %v327_v33 }
  0xac   : > { %v329_v35 = vmul.f32 1.442695, %v328_v34 }
  0xae   : > { %574 = vpow2.f32 %v329_v35 }
  0xb7   : > { %v573_v36 = vpop.eup %572 }
  0xb8   : > { %306 = vst.msk [vmem:[#allocation2] sm:$0xff] %vm282_vm1, %v573_v36  ;;  %v307_v37 = vsel %vm282_vm1, %v573_v36, 0.0 }
  0xb9   : > { %308 = vadd.xlane.f32.xlu1 %v307_v37 }
  0xbb   : > { %v575_v38 = vpop.eup %574 }
  0xbc   : > { %332 = vst.msk [vmem:[#allocation2 + $0x8] sm:$0xff] %vm282_vm1, %v575_v38  ;;  %v333_v39 = vsel %vm282_vm1, %v575_v38, 0.0 }
  0xbd   : > { %334 = vadd.xlane.f32.xlu1 %v333_v39 }
 0x142   : > { %v309_v40 = vpop.xlane.xlu1 %308 }
 0x143   : > { %576 = vrcp.f32 %v309_v40 }
 0x146   : > { %v335_v41 = vpop.xlane.xlu1 %334 }
 0x147   : > { %578 = vrcp.f32 %v335_v41 }
 0x150   : > { %v577_v42 = vpop.eup %576 }
 0x151   : > { %312 = vst.msk [vmem:[#allocation3] sm:$0xff] %vm277_vm3, %v577_v42 }
 0x154   : > { %v579_v43 = vpop.eup %578 }
 0x155   : > { %339 = vst.msk [vmem:[#allocation3 + $0x8] sm:$0xff] %vm277_vm3, %v579_v43 }
 0x156 PF: > { %v342_v44 = vld [vmem:[%s698_s28] sm:$0xff]  ;;  %vm344_vm4 = vcmask 261120   ;;  %v383_v48 = vld [vmem:[#allocation2 + $0x8] sm:$0xff]  ;;  %s374_s11 = scalar_select %p530_p5, 1, 0  ;;  %vm366_vm5 = vcmask 7168  }
 0x157   : > { %v343_v45 = vmul.f32 10.0, %v342_v44  ;;  %v368_v47 = vld [vmem:[#allocation2] sm:$0xff]  ;;  %p388_p6 = scmp.ne.s32.totalorder %s626_s20, 1  ;;  %v395_v5 = vld [vmem:[#allocation4 + $0x8] sm:$0xff]  ;;  %p357_p7 = scmp.lt.s32.totalorder %s626_s20, 2  ;;  %v364_v13 = vld [vmem:[#allocation5] sm:$0xff] }
 0x158   : > { %s375_s12 = scvt.s32.f32 %s374_s11  ;;  %v379_v62 = vld [vmem:[#allocation4] sm:$0xff]  ;;  %p533_p8 = scmp.ne.s32.totalorder %s626_s20, 3 }
 0x159   : > { %v345_v46 = vsel %vm344_vm4, %v343_v45, -inf  ;;  %v369_v49 = vmul.f32 %v368_v47, %v343_v45  ;;  %v384_v50 = vmul.f32 %v383_v48, %v343_v45  ;;  %s389_s13 = scalar_select %p388_p6, 1, 0 }
 0x15a   : > { %346 = vmax.xlane.f32.xlu0 %v345_v46  ;;  %v376_v58 = vstv %s375_s12  ;;  %s358_s15 = scalar_select %p357_p7, 1, 0 }
 0x15b   : > { %v370_v51 = vsel %vm344_vm4, %v369_v49, 0.0  ;;  %v385_v52 = vsel %vm344_vm4, %v384_v50, 0.0  ;;  %s390_s14 = scvt.s32.f32 %s389_s13 }
 0x15c   : > { %371 = vadd.xlane.f32.xlu1 %v370_v51  ;;  %s359_s16 = scvt.s32.f32 %s358_s15 }
 0x15d   : > { %v391_v63 = vstv %s390_s14 }
 0x15e   : > { %s360_s17 = ssub.f32 2.0, %s359_s16 }
 0x160   : > { %386 = vadd.xlane.f32.xlu1 %v385_v52  ;;  %v361_v10 = vstv %s360_s17 }
 0x1e3   : > { %v347_v53 = vpop.xlane.xlu0 %346 }
 0x1e4   : > { %v348_v54 = vsub.f32 %v343_v45, %v347_v53 }
 0x1e5   : > { %v372_v59 = vpop.xlane.xlu1 %371 }
 0x1e6   : > { %v349_v55 = vmul.f32 1.442695, %v348_v54  ;;  %v377_v60 = vmul.f32 %v376_v58, %v372_v59 }
 0x1e8   : > { %580 = vpow2.f32 %v349_v55  ;;  %v378_v61 = vmul.f32 %v700_v3, %v377_v60 }
 0x1e9   : > { %v387_v0 = vpop.xlane.xlu1 %386 }
 0x1ea   : > { %v380_v1 = vadd.f32 %v379_v62, %v378_v61  ;;  %v392_v2 = vmul.f32 %v391_v63, %v387_v0 }
 0x1ec   : > { %381 = vst.msk [vmem:[#allocation4] sm:$0xff] %vm366_vm5, %v380_v1  ;;  %v393_v4 = vmul.f32 %v700_v3, %v392_v2 }
 0x1ee   : > { %v396_v6 = vadd.f32 %v395_v5, %v393_v4 }
 0x1f0   : > { %397 = vst.msk [vmem:[#allocation4 + $0x8] sm:$0xff] %vm366_vm5, %v396_v6 }
 0x1f5   : > { %v581_v56 = vpop.eup %580 }
 0x1f6   : > { %v351_v57 = vsel %vm344_vm4, %v581_v56, 0.0 }
 0x1f7   : > { %352 = vadd.xlane.f32.xlu0 %v351_v57 }
 0x280   : > { %v353_v7 = vpop.xlane.xlu0 %352 }
 0x281   : > { %582 = vlog2.f32 %v353_v7 }
 0x28e   : > { %v583_v8 = vpop.eup %582 }
 0x28f   : > { %v355_v9 = vmul.f32 0.6931472, %v583_v8 }
 0x291   : > { %v356_v11 = vadd.f32 %v355_v9, %v347_v53 }
 0x293   : > { %v362_v12 = vmul.f32 %v361_v10, %v356_v11 }
 0x295   : > { %v363_v14 = vmul.f32 %v700_v3, %v362_v12  ;;  %401 = sbr.rel (%p533_p8) target bundleno = 691 (0x2b3), region = 44 }
 0x297   : > { %v365_v15 = vadd.f32 %v364_v13, %v363_v14 }
 0x299   : > { %367 = vst.msk [vmem:[#allocation5] sm:$0xff] %vm366_vm5, %v365_v15 }
 0x29a   : > { %v403_v17 = vld [vmem:[#allocation4] sm:$0xff]  ;;  %v404_v18 = vld [vmem:[#allocation3] sm:$0xff]  ;;  %vm422_vm6 = vcmask 253952   ;;  %v407_v20 = vld [vmem:[#allocation4 + $0x8] sm:$0xff]  ;;  %vm419_vm7 = vcmask 0  }
 0x29b   : > { %v405_v19 = vmul.f32 %v404_v18, %v403_v17  ;;  %v409_v21 = vld [vmem:[#allocation3 + $0x8] sm:$0xff] }
 0x29c   : > { %v421_v22 = vld [vmem:[#allocation6] sm:$0x1]  ;;  %v410_v23 = vmul.f32 %v409_v21, %v407_v20 }
 0x29d   : > { %423 = vst.msk [vmem:[%s778_s5] sm:$0x1] %vm422_vm6, %v421_v22 }
 0x2a0   : > { %v402_v16 = vld [vmem:[#allocation5] sm:$0xff] }
 0x2a1   : > { %v406_v3 = vsub.f32 %v402_v16, %v405_v19 }
 0x2a3   : > { %v411_v24 = vsub.f32 %v406_v3, %v410_v23 }
 0x2a5   : > { %v412_v25 = vsel %vm366_vm5, %v411_v24, 0.0 }
 0x2a6   : > { %v413_v26 = vrot.slane %v412_v25, 4 }
 0x2a8   : > { %v414_v27 = vadd.f32 %v413_v26, %v412_v25 }
 0x2aa   : > { %v415_v28 = vrot.slane %v414_v27, 2 }
 0x2ac   : > { %v416_v29 = vadd.f32 %v415_v28, %v414_v27 }
 0x2ae   : > { %v417_v30 = vrot.slane %v416_v29, 1 }
 0x2b0   : > { %v418_v31 = vadd.f32 %v417_v30, %v416_v29 }
 0x2b2   : > { %420 = vst.msk [vmem:[#allocation8] sm:$0x1] %vm419_vm7, %v418_v31 }
 0x2b3 PF: > { %p749_p9 = scmp.eq.s32.totalorder %s523_s0, 3  ;;  %s638_s24 = smov [#allocation8]  }
 0x2b4   : > { %s436_s25 = sshll.u32 %s638_s24, 4  ;;  %s437_s25 = int_to_ptr.vmem [resolvable:$true] %s436_s25 }
 0x2b5   : > { %s584_s26 = scalar_lea.vmem %s437_s25, 16  ;;  %s590_s27 = scalar_lea.vmem %s437_s25, 32 }
 0x2b6   : > { %p585_p10 = scmp.ne.s32.totalorder %s437_s25, %s584_s26  ;;  %p591_p13 = scmp.lt.s32.totalorder %s437_s25, %s437_s25 }
 0x2b7   : > { %p592_p0 = scmp.lt.s32.totalorder %s590_s27, %s584_s26 }
 0x2b8   : > { %p586_p11 = pnand %p585_p10, %p749_p9 }
 0x2b9   : > { %p593_p1 = por %p592_p0, %p591_p13 }
 0x2ba   : > { %p587_p12 = pneg %p586_p11 }
 0x2bc   : > { %p594_p2 = pnand %p593_p1, %p587_p12 }
 0x2be   : > { %597 = shalt.err (!%p594_p2)
}
 0x2bf   : > { %540 = dma.vmem_to_hbm [thread:$0]  (%p749_p9), %s437_s25, 16, %s777_s4, [#allocation9]  }
 0x2c0   : > { %621 = dma.done.wait (%p749_p9), [#allocation9], 16  }
 0x2c1   : > { %623 = vsyncadd (%p749_p9), [#allocation9], 4294967280 }
 0x2c2 PF: > { %s18_s22 = sadd.s32 1, %s634_s22   ;;  %s780_s20 = smov %s630_s21 }
 0x2c3   : > { %p15_p3 = scmp.ge.s32.totalorder %s18_s22, 6   ;;  %s781_s21 = smov %s783_s23 }
 0x2c5   :  { %17 = sbr.rel (!%p15_p3) target bundleno = 4 (0x4), region = 93 }
 0x2ca   :  { %458 = vsyncpa [#allocation9], 1 }
 0x2cb   :  { %460 = vsyncpa [#allocation9 + $0x1], 1 }

</bundles_post_ra>
